<compile_context>
chip_gen: v7x
topology: tpu7x:2x2x1
jax: 0.10.0
libtpu: 0.0.40
codegen_flags: <defaults>
</compile_context>

<pallas_src>
import math

import jax
import jax.numpy as jnp
from jax.experimental import pallas as pl
from jax.experimental.pallas import tpu as pltpu

HIDDEN = 128
_SPLIT_THRESHOLD = 512   # batch >= this -> force >=2 grid tiles (v7x has 2 TCs)


def _round_up(n, m):
    return ((n + m - 1) // m) * m


def actor_net_kernel(x_ref, w1_ref, b1_ref, w2_ref, b2_ref, w3_ref, out_ref):
    # Layer 1: Linear(obs -> 128) + ReLU. LHS cast to bf16 in-register (no
    # padded HBM copy of x); MXU accumulates in f32.
    x = x_ref[...].astype(jnp.bfloat16)
    h1 = jnp.dot(x, w1_ref[...], preferred_element_type=jnp.float32)
    h1 = jnp.maximum(h1 + b1_ref[...], 0.0)          # f32 epilogue on VPU

    # Layer 2: Linear(128 -> 128) + ReLU.
    h2 = jnp.dot(h1.astype(jnp.bfloat16), w2_ref[...],
                 preferred_element_type=jnp.float32)
    h2 = jnp.maximum(h2 + b2_ref[...], 0.0)

    # Layer 3: Linear(128 -> action, bias=False) + Tanh. Narrow (tm, action)
    # output block: masked stores, but ~32x less writeback than a padded
    # 128-lane slab.
    h3 = jnp.dot(h2.astype(jnp.bfloat16), w3_ref[...],
                 preferred_element_type=jnp.float32)
    out_ref[...] = jnp.tanh(h3).astype(out_ref.dtype)


def prepare_actor_params(w1, b1, w2, b2, w3):
    """One-time weight prep (hoisted out of the per-call path): cast MXU
    operands to bf16, reshape biases to (1, 128) f32 rows."""
    return (w1.astype(jnp.bfloat16),
            jnp.asarray(b1, jnp.float32).reshape(1, HIDDEN),
            w2.astype(jnp.bfloat16),
            jnp.asarray(b2, jnp.float32).reshape(1, HIDDEN),
            w3.astype(jnp.bfloat16))


def actor_net_forward(x, w1_bf, b1_f, w2_bf, b2_f, w3_bf, *, tm=2048):
    """x: (B, obs) f32; prepped params from prepare_actor_params().
    Returns (B, action) float32."""
    batch, obs = x.shape
    action = w3_bf.shape[1]

    # Batch tile: large tiles amortize the ~0.35us/grid-step overhead; for
    # large batches force >=2 tiles so the "parallel" axis can shard across
    # the two TensorCores on v7x (one extra cheap step on v5e/v6e).
    if batch >= _SPLIT_THRESHOLD:
        tm_eff = min(tm, _round_up((batch + 1) // 2, 8))
    else:
        tm_eff = min(tm, _round_up(batch, 8))
    batch_p = _round_up(batch, tm_eff)

    # Only pad the batch axis when needed (no padded-obs copy of x at all).
    x_in = x if batch_p == batch else jnp.pad(x, ((0, batch_p - batch), (0, 0)))

    const = lambda shape: pl.BlockSpec(shape, lambda i: (0, 0))

    out_p = pl.pallas_call(
        actor_net_kernel,
        out_shape=jax.ShapeDtypeStruct((batch_p, action), jnp.float32),
        grid=(batch_p // tm_eff,),
        in_specs=[
            pl.BlockSpec((tm_eff, obs), lambda i: (i, 0)),  # x streamed over batch
            const((obs, HIDDEN)),                           # weights stay resident
            const((1, HIDDEN)),
            const((HIDDEN, HIDDEN)),
            const((1, HIDDEN)),
            const((HIDDEN, action)),
        ],
        out_specs=pl.BlockSpec((tm_eff, action), lambda i: (i, 0)),
        compiler_params=pltpu.CompilerParams(
            dimension_semantics=("parallel",)),   # batch tiles across TCs (v7x)
    )(x_in, w1_bf, b1_f, w2_bf, b2_f, w3_bf)

    return out_p if batch_p == batch else out_p[:batch]


def kaiming_uniform(key, fan_in, fan_out):
    """nn.init.kaiming_uniform_(W, nonlinearity='relu') for W of shape
    (fan_out, fan_in); returned in the transposed (fan_in, fan_out) layout."""
    gain = math.sqrt(2.0)                       # relu gain
    bound = gain * math.sqrt(3.0 / fan_in)
    w = jax.random.uniform(key, (fan_out, fan_in), jnp.float32, -bound, bound)
    return w.T                                  # store as (in, out)


def _reference(x, w1, b1, w2, b2, w3):
    h = jnp.maximum(x @ w1 + b1.reshape(1, -1), 0.0)
    h = jnp.maximum(h @ w2 + b2.reshape(1, -1), 0.0)
    return jnp.tanh(h @ w3)


if __name__ == "__main__":
    observation_size = 32
    action_size = 4

    key = jax.random.PRNGKey(0)
    kx, kx2, k1, k2, k3 = jax.random.split(key, 5)

    # Deterministic Kaiming-uniform weights, zero biases (init_weights_kaiming).
    w1 = kaiming_uniform(k1, observation_size, 128)     # (obs, 128)
    b1 = jnp.zeros((128,), jnp.float32)
    w2 = kaiming_uniform(k2, 128, 128)                  # (128, 128)
    b2 = jnp.zeros((128,), jnp.float32)
    w3 = kaiming_uniform(k3, 128, action_size)          # (128, action)

    # One-time weight prep, reused across calls (hoisted off the call path).
    params = prepare_actor_params(w1, b1, w2, b2, w3)

    # Small-shape check (module-typical batch=8): single grid step.
    x_small = jax.random.normal(kx, (8, observation_size), jnp.float32)
    out_small = jax.block_until_ready(actor_net_forward(x_small, *params))
    ref_small = _reference(x_small, w1, b1, w2, b2, w3)
    assert out_small.shape == (8, action_size)
    # bf16 MXU operands -> loosened tolerance (accumulation stays f32).
    assert jnp.allclose(out_small, ref_small, atol=5e-2, rtol=5e-2)

    # Batched check exercising a multi-step grid (2 tiles) + resident weights.
    x_big = jax.random.normal(kx2, (1024, observation_size), jnp.float32)
    out_big = jax.block_until_ready(actor_net_forward(x_big, *params))
    ref_big = _reference(x_big, w1, b1, w2, b2, w3)
    assert out_big.shape == (1024, action_size)
    assert jnp.allclose(out_big, ref_big, atol=5e-2, rtol=5e-2)

    print("KERNEL_OK")
</pallas_src>

<mosaic_0001>
module attributes {stable_mosaic.version = 11 : i64} {
  func.func @actor_net_kernel(%arg0: i32, %arg1: memref<8x32xf32, #tpu.memory_space<vmem>>, %arg2: memref<32x128xbf16, #tpu.memory_space<vmem>>, %arg3: memref<1x128xf32, #tpu.memory_space<vmem>>, %arg4: memref<128x128xbf16, #tpu.memory_space<vmem>>, %arg5: memref<1x128xf32, #tpu.memory_space<vmem>>, %arg6: memref<128x4xbf16, #tpu.memory_space<vmem>>, %arg7: memref<8x4xf32, #tpu.memory_space<vmem>>) attributes {dimension_semantics = [#tpu.dimension_semantics<parallel>], iteration_bounds = array<i64: 1>, scalar_prefetch = 0 : i64, scratch_operands = 0 : i64, tpu.core_type = #tpu.core_type<tc>, window_params = [{transform_indices = @transform_0, window_bounds = array<i64: 8, 32>}, {pipeline_mode = #tpu.pipeline_mode<synchronous>, transform_indices = @transform_1, window_bounds = array<i64: 32, 128>}, {pipeline_mode = #tpu.pipeline_mode<synchronous>, transform_indices = @transform_2, window_bounds = array<i64: 1, 128>}, {pipeline_mode = #tpu.pipeline_mode<synchronous>, transform_indices = @transform_3, window_bounds = array<i64: 128, 128>}, {pipeline_mode = #tpu.pipeline_mode<synchronous>, transform_indices = @transform_4, window_bounds = array<i64: 1, 128>}, {pipeline_mode = #tpu.pipeline_mode<synchronous>, transform_indices = @transform_5, window_bounds = array<i64: 128, 4>}, {transform_indices = @transform_6, window_bounds = array<i64: 8, 4>}]} {
    %c0 = arith.constant 0 : index
    %c0_0 = arith.constant 0 : index
    %0 = vector.load %arg1[%c0, %c0_0] : memref<8x32xf32, #tpu.memory_space<vmem>>, vector<8x32xf32>
    %1 = arith.truncf %0 : vector<8x32xf32> to vector<8x32xbf16>
    %c0_1 = arith.constant 0 : index
    %c0_2 = arith.constant 0 : index
    %2 = vector.load %arg2[%c0_1, %c0_2] : memref<32x128xbf16, #tpu.memory_space<vmem>>, vector<32x128xbf16>
    %cst = arith.constant dense<0.000000e+00> : vector<8x128xf32>
    %3 = tpu.matmul %1, %2, %cst {dimension_numbers = #tpu.dot_dimension_numbers<[1], [0], [0], [1], [0, 0, 1, 1], [], []>} : vector<8x32xbf16>, vector<32x128xbf16>, vector<8x128xf32> -> vector<8x128xf32>
    %c0_3 = arith.constant 0 : index
    %c0_4 = arith.constant 0 : index
    %4 = vector.load %arg3[%c0_3, %c0_4] : memref<1x128xf32, #tpu.memory_space<vmem>>, vector<1x128xf32>
    %5 = vector.broadcast %4 : vector<1x128xf32> to vector<8x128xf32>
    %6 = arith.addf %3, %5 : vector<8x128xf32>
    %cst_5 = arith.constant 0.000000e+00 : f32
    %7 = vector.broadcast %cst_5 : f32 to vector<8x128xf32>
    %8 = arith.maximumf %6, %7 : vector<8x128xf32>
    %9 = arith.truncf %8 : vector<8x128xf32> to vector<8x128xbf16>
    %c0_6 = arith.constant 0 : index
    %c0_7 = arith.constant 0 : index
    %10 = vector.load %arg4[%c0_6, %c0_7] : memref<128x128xbf16, #tpu.memory_space<vmem>>, vector<128x128xbf16>
    %cst_8 = arith.constant dense<0.000000e+00> : vector<8x128xf32>
    %11 = tpu.matmul %9, %10, %cst_8 {dimension_numbers = #tpu.dot_dimension_numbers<[1], [0], [0], [1], [0, 0, 1, 1], [], []>} : vector<8x128xbf16>, vector<128x128xbf16>, vector<8x128xf32> -> vector<8x128xf32>
    %c0_9 = arith.constant 0 : index
    %c0_10 = arith.constant 0 : index
    %12 = vector.load %arg5[%c0_9, %c0_10] : memref<1x128xf32, #tpu.memory_space<vmem>>, vector<1x128xf32>
    %13 = vector.broadcast %12 : vector<1x128xf32> to vector<8x128xf32>
    %14 = arith.addf %11, %13 : vector<8x128xf32>
    %cst_11 = arith.constant 0.000000e+00 : f32
    %15 = vector.broadcast %cst_11 : f32 to vector<8x128xf32>
    %16 = arith.maximumf %14, %15 : vector<8x128xf32>
    %17 = arith.truncf %16 : vector<8x128xf32> to vector<8x128xbf16>
    %c0_12 = arith.constant 0 : index
    %c0_13 = arith.constant 0 : index
    %18 = vector.load %arg6[%c0_12, %c0_13] : memref<128x4xbf16, #tpu.memory_space<vmem>>, vector<128x4xbf16>
    %cst_14 = arith.constant dense<0.000000e+00> : vector<8x4xf32>
    %19 = tpu.matmul %17, %18, %cst_14 {dimension_numbers = #tpu.dot_dimension_numbers<[1], [0], [0], [1], [0, 0, 1, 1], [], []>} : vector<8x128xbf16>, vector<128x4xbf16>, vector<8x4xf32> -> vector<8x4xf32>
    %20 = math.tanh %19 : vector<8x4xf32>
    %c0_15 = arith.constant 0 : index
    %c0_16 = arith.constant 0 : index
    %21 = vector.load %arg7[%c0_15, %c0_16] : memref<8x4xf32, #tpu.memory_space<vmem>>, vector<8x4xf32>
    tpu.vector_store %arg7[%c0_15, %c0_16], %20 {strides = array<i32>} : memref<8x4xf32, #tpu.memory_space<vmem>>, vector<8x4xf32>,
    return
  }
  func.func @transform_0(%arg0: i32) -> (i32, i32) {
    %c0_i32 = arith.constant 0 : i32
    %c0_i32_0 = arith.constant 0 : i32
    return %arg0, %c0_i32 : i32, i32
  }
  func.func @transform_1(%arg0: i32) -> (i32, i32) {
    %c0_i32 = arith.constant 0 : i32
    %c0_i32_0 = arith.constant 0 : i32
    %c0_i32_1 = arith.constant 0 : i32
    return %c0_i32, %c0_i32_0 : i32, i32
  }
  func.func @transform_2(%arg0: i32) -> (i32, i32) {
    %c0_i32 = arith.constant 0 : i32
    %c0_i32_0 = arith.constant 0 : i32
    %c0_i32_1 = arith.constant 0 : i32
    return %c0_i32, %c0_i32_0 : i32, i32
  }
  func.func @transform_3(%arg0: i32) -> (i32, i32) {
    %c0_i32 = arith.constant 0 : i32
    %c0_i32_0 = arith.constant 0 : i32
    %c0_i32_1 = arith.constant 0 : i32
    return %c0_i32, %c0_i32_0 : i32, i32
  }
  func.func @transform_4(%arg0: i32) -> (i32, i32) {
    %c0_i32 = arith.constant 0 : i32
    %c0_i32_0 = arith.constant 0 : i32
    %c0_i32_1 = arith.constant 0 : i32
    return %c0_i32, %c0_i32_0 : i32, i32
  }
  func.func @transform_5(%arg0: i32) -> (i32, i32) {
    %c0_i32 = arith.constant 0 : i32
    %c0_i32_0 = arith.constant 0 : i32
    %c0_i32_1 = arith.constant 0 : i32
    return %c0_i32, %c0_i32_0 : i32, i32
  }
  func.func @transform_6(%arg0: i32) -> (i32, i32) {
    %c0_i32 = arith.constant 0 : i32
    %c0_i32_0 = arith.constant 0 : i32
    return %arg0, %c0_i32 : i32, i32
  }
}

</mosaic_0001>

<bundles_post_ra>
// kernel: tpu_custom_call.1
= control target key start
LH: loop header
LB: loop body
LE: loop exit
PB: predicated region body
PF: predicated region fallthrough
CT: control target
= control target key end

     0   :  { %11 = vsyncpa [#allocation3], 0  ;;  %s473_s21 = smov [#allocation2]   ;;  %s609_s0 = inlined_call_operand.vmem [shape: f32[8,32], index: 0, kind: input, shape index: {}]   ;;  %s610_s1 = inlined_call_operand.hbm [shape: bf16[32,128], index: 1, kind: input, shape index: {}]   ;;  %s611_s2 = inlined_call_operand.vmem [shape: f32[1,128], index: 2, kind: input, shape index: {}]   ;;  %s612_s3 = inlined_call_operand.vmem [shape: bf16[128,128], index: 3, kind: input, shape index: {}]   ;;  %s613_s4 = inlined_call_operand.vmem [shape: f32[1,128], index: 4, kind: input, shape index: {}]   ;;  %s614_s5 = inlined_call_operand.vmem [shape: bf16[128,4], index: 5, kind: input, shape index: {}]   ;;  %s615_s6 = inlined_call_operand.vmem [shape: f32[8,4], index: 6, kind: output, shape index: {}]  }
   0x1   :  { %s19_s22 = sshll.u32 %s473_s21, 4  ;;  %s449_s25 = scalar_lea.hbm %s610_s1, 256  ;;  %s20_s22 = int_to_ptr.vmem [resolvable:$true] %s19_s22 }
   0x2   :  { %p450_p0 = scmp.ne.s32.totalorder %s610_s1, %s449_s25  ;;  %p453_p1 = scmp.lt.u32.totalorder %s449_s25, %s610_s1 }
   0x4   :  { %p455_p2 = pnand %p453_p1, %p450_p0 }
   0x6   :  { %458 = shalt.err (!%p455_p2)
}
   0x7   :  { %s459_s30 = scalar_lea.vmem %s20_s22, 256  ;;  %p464_p4 = scmp.lt.s32.totalorder %s20_s22, %s20_s22 }
   0x8   :  { %p460_p3 = scmp.ne.s32.totalorder %s20_s22, %s459_s30  ;;  %p465_p5 = scmp.lt.s32.totalorder %s459_s30, %s459_s30 }
   0xa   :  { %p466_p6 = por %p465_p5, %p464_p4 }
   0xc   :  { %p467_p7 = pnand %p466_p6, %p460_p3 }
   0xe   :  { %470 = shalt.err (!%p467_p7)
}
   0xf   :  { %s474_s7 = smov 64   ;;  %s475_s8 = smov 4  }
  0x10   :  { %25 = dma.hbm_to_vmem [thread:$0]  %s610_s1, 256, %s20_s22, [#allocation3], %s474_s7, %s474_s7, %s475_s8  }
  0x11   :  { %471 = dma.done.wait [#allocation3], 256  }
  0x12   :  { %472 = vsyncadd [#allocation3], 4294967040  ;;  %v476_v0 = vmov 0.0   ;;  %vm477_vm0 = vmmov 0   ;;  %v429_v1 = vld [vmem:[#allocation2] sm:$0xff]   ;;  %v430_v2 = vld [vmem:[#allocation2 + $0x8] sm:$0xff]  }
  0x13   :  { %376 = vmatprep.subr.bf16.mxu0 %v476_v0  ;;  %380 = vmatprep.mubr.msk.bf16.mxu0 %vm477_vm0, %v476_v0  ;;  %v38_v3 = vld [vmem:[%s609_s0] sm:$0xff]  ;;  %v432_v6 = vld [vmem:[%s612_s3 + $0x8] sm:$0xff]   ;;  %vm63_vm1 = vcmask 261120   ;;  %v433_v7 = vld [vmem:[%s612_s3 + $0x10] sm:$0xff]   ;;  %vm327_vm2 = vcmask 31744  }
  0x14   :  { %384 = vmatprep.subr.bf16.mxu1 %v476_v0  ;;  %400 = vmatprep.mubr.msk.bf16.mxu1 %vm477_vm0, %v476_v0  ;;  %v431_v4 = vld [vmem:[%s612_s3] sm:$0xff]   ;;  %v39_v5 = vpack.c.bf16 %v38_v3, %v38_v3  ;;  %v434_v8 = vld [vmem:[%s612_s3 + $0x18] sm:$0xff]   ;;  %v436_v10 = vld [vmem:[%s612_s3 + $0x28] sm:$0xff]  }
  0x15   :  { %377 = vmatpush3.bf16.msra.mxu0 %v429_v1  ;;  %385 = vmatpush3.bf16.msra.mxu1 %v431_v4  ;;  %v435_v9 = vld [vmem:[%s612_s3 + $0x20] sm:$0xff]   ;;  %v437_v11 = vld [vmem:[%s612_s3 + $0x30] sm:$0xff]   ;;  %v438_v12 = vld [vmem:[%s612_s3 + $0x38] sm:$0xff]  }
  0x16   :  { %378 = vmatprep.subr.bf16.mxu0 %v476_v0  ;;  %386 = vmatprep.subr.bf16.mxu1 %v476_v0  ;;  %v439_v13 = vld [vmem:[%s614_s5] sm:$0xff]   ;;  %v440_v14 = vld [vmem:[%s614_s5 + $0x8] sm:$0xff]   ;;  %v441_v15 = vld [vmem:[%s614_s5 + $0x10] sm:$0xff]  }
  0x17   :  { %v442_v16 = vld [vmem:[%s614_s5 + $0x18] sm:$0xff]   ;;  %v443_v17 = vld [vmem:[%s614_s5 + $0x20] sm:$0xff]   ;;  %v444_v18 = vld [vmem:[%s614_s5 + $0x28] sm:$0xff]  }
  0x18   :  { %v334_v19 = vld [vmem:[%s611_s2] ss:$0 sm:$0xff]  ;;  %v445_v27 = vld [vmem:[%s614_s5 + $0x30] sm:$0xff]   ;;  %v446_v28 = vld [vmem:[%s614_s5 + $0x38] sm:$0xff]  }
  0x19   :  { %379 = vmatpush3.bf16.msra.mxu0 %v430_v2  ;;  %387 = vmatpush3.bf16.msra.mxu1 %v432_v6  ;;  %v338_v29 = vld [vmem:[%s613_s4] ss:$0 sm:$0xff] }
  0x1a   :  { %404 = vmatprep.subr.bf16.mxu0 %v476_v0  ;;  %388 = vmatprep.subr.bf16.mxu1 %v476_v0 }
  0x1c   :  { %381 = vmatmul.mubr.msk.bf16.vlgmr.msra.gmra.mrb[0].mxu0 %vm63_vm1, %v39_v5 }
  0x1d   :  { %420 = vmatprep.mubr.msk.bf16.mxu0 %vm477_vm0, %v476_v0  ;;  %389 = vmatpush3.bf16.msra.mxu1 %v433_v7 }
  0x1e   :  { %390 = vmatprep.subr.bf16.mxu1 %v476_v0  ;;  %405 = vmatpush3.bf16.msra.mxu0 %v439_v13 }
  0x1f   :  { %406 = vmatprep.subr.bf16.mxu0 %v476_v0 }
  0x21   :  { %391 = vmatpush3.bf16.msra.mxu1 %v434_v8 }
  0x22   :  { %392 = vmatprep.subr.bf16.mxu1 %v476_v0  ;;  %407 = vmatpush3.bf16.msra.mxu0 %v440_v14 }
  0x23   :  { %408 = vmatprep.subr.bf16.mxu0 %v476_v0 }
  0x25   :  { %393 = vmatpush3.bf16.msra.mxu1 %v435_v9 }
  0x26   :  { %394 = vmatprep.subr.bf16.mxu1 %v476_v0  ;;  %409 = vmatpush3.bf16.msra.mxu0 %v441_v15 }
  0x27   :  { %410 = vmatprep.subr.bf16.mxu0 %v476_v0 }
  0x29   :  { %395 = vmatpush3.bf16.msra.mxu1 %v436_v10 }
  0x2a   :  { %396 = vmatprep.subr.bf16.mxu1 %v476_v0  ;;  %411 = vmatpush3.bf16.msra.mxu0 %v442_v16 }
  0x2b   :  { %412 = vmatprep.subr.bf16.mxu0 %v476_v0 }
  0x2d   :  { %397 = vmatpush3.bf16.msra.mxu1 %v437_v11 }
  0x2e   :  { %398 = vmatprep.subr.bf16.mxu1 %v476_v0  ;;  %413 = vmatpush3.bf16.msra.mxu0 %v443_v17 }
  0x2f   :  { %414 = vmatprep.subr.bf16.mxu0 %v476_v0 }
  0x31   :  { %399 = vmatpush3.bf16.msra.mxu1 %v438_v12 }
  0x32   :  { %415 = vmatpush3.bf16.msra.mxu0 %v444_v18 }
  0x33   :  { %416 = vmatprep.subr.bf16.mxu0 %v476_v0 }
  0x36   :  { %417 = vmatpush3.bf16.msra.mxu0 %v445_v27 }
  0x37   :  { %418 = vmatprep.subr.bf16.mxu0 %v476_v0 }
  0x3a   :  { %419 = vmatpush3.bf16.msra.mxu0 %v446_v28 }
  0xef   :  { %v101_v20 = vpop.f32.mrb[0].mxu0 }
  0xf0   :  { %v102_v21 = vadd.f32 %v334_v19, %v101_v20  ;;  %v382_v22 = vpop.f32.mrb[1].mxu0 }
  0xf1   :  { %v104_v23 = vpop.f32.mrb[2].mxu0 }
  0xf2   :  { %v107_v24 = vmax.f32 %v102_v21, 0.0  ;;  %v383_v25 = vpop.f32.mrb[3].mxu0 }
  0xf4   :  { %v108_v26 = vpack.c.bf16 %v107_v24, %v107_v24 }
  0xf6   :  { %401 = vmatmul.mubr.bf16.vlgmr.msra.gmra.mrb[0].mxu1 %v108_v26 }
 0x1c9   :  { %v214_v30 = vpop.f32.mrb[0].mxu1 }
 0x1ca   :  { %v215_v31 = vadd.f32 %v338_v29, %v214_v30  ;;  %v402_v32 = vpop.f32.mrb[1].mxu1 }
 0x1cb   :  { %v217_v33 = vpop.f32.mrb[2].mxu1 }
 0x1cc   :  { %v220_v34 = vmax.f32 %v215_v31, 0.0  ;;  %v403_v35 = vpop.f32.mrb[3].mxu1 }
 0x1ce   :  { %v221_v36 = vpack.c.bf16 %v220_v34, %v220_v34 }
 0x1d0   :  { %421 = vmatmul.mubr.bf16.vlgmr.msra.gmra.mrb[4].mxu0 %v221_v36 }
 0x2a3   :  { %v320_v37 = vpop.f32.mrb[4].mxu0 }
 0x2a4   :  { %447 = vtanh.f32 %v320_v37  ;;  %v422_v38 = vpop.f32.mrb[5].mxu0 }
 0x2a5   :  { %v323_v39 = vpop.f32.mrb[6].mxu0 }
 0x2a6   :  { %v423_v40 = vpop.f32.mrb[7].mxu0 }
 0x2ae   :  { %v448_v41 = vpop.eup %447 }
 0x2af   :  { %328 = vst.msk [vmem:[%s615_s6] sm:$0xff] %vm327_vm2, %v448_v41 }
 0x2b0   :  { %333 = vsyncpa [#allocation3], 1 }

</bundles_post_ra>
